<compile_context>
chip_gen: v7x
topology: tpu7x:2x2x1
jax: 0.10.0
libtpu: 0.0.40
codegen_flags: <defaults>
</compile_context>

<pallas_src>
from math import ceil

import jax
import jax.numpy as jnp
from jax.experimental import pallas as pl
from jax.experimental.pallas import tpu as pltpu


# ---------------------------------------------------------------------------
# Kernels
# ---------------------------------------------------------------------------
def easg_clip_kernel(clip_ref, wc_ref, bc_ref, bo_ref, mask_ref,
                     out_clip_ref, row_bias_ref):
    """Runs once per forward: one (1, D_clip) @ (D_clip, SLAB) GEMV.

    out_clip (1, SLAB) f32: cols [0, n_verbs)         -> verb logits
                            cols [rel_off, +n_rels)   -> clip @ Wr_clip + br
    row_bias (1, SLAB) f32: bo + rel_mask * out_clip  (consumed by row kernel)
    """
    clip_out = (
        jnp.dot(clip_ref[...], wc_ref[...], preferred_element_type=jnp.float32)
        + bc_ref[...]
    )
    out_clip_ref[...] = clip_out
    row_bias_ref[...] = bo_ref[...] + mask_ref[...] * clip_out


def easg_rows_kernel(obj_ref, wo_ref, bias_ref, out_ref):
    """Steady-state row tile: one (TM, D_obj) @ (D_obj, SLAB) MXU dot plus one
    broadcast add (f32 epilogue).  obj tiles stream (double-buffered); wo and
    bias are VMEM-resident (constant index_map)."""
    out_ref[...] = (
        jnp.dot(obj_ref[...], wo_ref[...], preferred_element_type=jnp.float32)
        + bias_ref[...]
    )


# ---------------------------------------------------------------------------
# One-time parameter preparation
# ---------------------------------------------------------------------------
def prepare_params(params, dim_clip_feat, dim_obj_feat,
                   compute_dtype=jnp.bfloat16):
    """Transpose, column-concat, zero-pad to a 128-lane-dense slab, cast the
    big weight slabs to `compute_dtype` (bf16 halves HBM traffic for this
    bandwidth-bound GEMM); biases / mask stay f32 for the epilogue."""
    Wv, bv, Wo, bo, Wr, br = (params[k] for k in
                              ("Wv", "bv", "Wo", "bo", "Wr", "br"))
    n_verbs, n_objs, n_rels = Wv.shape[0], Wo.shape[0], Wr.shape[0]
    rel_off = max(n_verbs, n_objs)                        # rels segment offset
    slab_w = int(ceil((rel_off + n_rels) / 128.0)) * 128  # lane-dense width

    wc = jnp.zeros((dim_clip_feat, slab_w), compute_dtype)
    wc = wc.at[:, :n_verbs].set(Wv.T.astype(compute_dtype))
    wc = wc.at[:, rel_off:rel_off + n_rels].set(
        Wr[:, :dim_clip_feat].T.astype(compute_dtype))
    bc = jnp.zeros((1, slab_w), jnp.float32)
    bc = bc.at[0, :n_verbs].set(bv)
    bc = bc.at[0, rel_off:rel_off + n_rels].set(br)

    wo = jnp.zeros((dim_obj_feat, slab_w), compute_dtype)
    wo = wo.at[:, :n_objs].set(Wo.T.astype(compute_dtype))
    wo = wo.at[:, rel_off:rel_off + n_rels].set(
        Wr[:, dim_clip_feat:].T.astype(compute_dtype))
    bo2 = jnp.zeros((1, slab_w), jnp.float32)
    bo2 = bo2.at[0, :n_objs].set(bo)

    # 1.0 on relation lanes, 0.0 elsewhere (replaces iota/compare/where).
    rel_mask = jnp.zeros((1, slab_w), jnp.float32)
    rel_mask = rel_mask.at[0, rel_off:rel_off + n_rels].set(1.0)

    return dict(
        wc=wc, bc=bc, wo=wo, bo=bo2, rel_mask=rel_mask,
        n_verbs=n_verbs, n_objs=n_objs, n_rels=n_rels,
        rel_off=rel_off, slab_w=slab_w,
        dim_clip_feat=dim_clip_feat, dim_obj_feat=dim_obj_feat,
        compute_dtype=compute_dtype,
    )


def _choose_row_tile(n_rows, d_obj, slab_w, act_bytes=2,
                     budget_bytes=40 * 1024 * 1024, max_tile=2048):
    """Row tile sized so resident weights + double-buffered in/out tiles fit a
    40 MiB budget (safe on v7x's 64 MiB VMEM; v5e/v6e have 128 MiB)."""
    if n_rows <= max_tile:
        return n_rows                       # single full-extent row block
    resident = d_obj * slab_w * act_bytes + slab_w * 4
    per_row = 2 * (d_obj * act_bytes + slab_w * 4)   # 2x-buffered in + f32 out
    tm = (budget_bytes - resident) // max(per_row, 1)
    tm = int(max(256, min(tm, max_tile)))
    return (tm // 8) * 8


# ---------------------------------------------------------------------------
# Forward
# ---------------------------------------------------------------------------
def easg_forward(clip_feat, obj_feats, prep):
    """clip_feat: (D_clip,); obj_feats: (N, D_obj).
    Returns (out_verb (n_verbs,), out_objs (N, n_objs), out_rels (N, n_rels))."""
    n_verbs, n_objs, n_rels = prep["n_verbs"], prep["n_objs"], prep["n_rels"]
    rel_off, slab_w = prep["rel_off"], prep["slab_w"]
    D_clip, D_obj = prep["dim_clip_feat"], prep["dim_obj_feat"]
    cdt = prep["compute_dtype"]
    elt = jnp.dtype(cdt).itemsize
    N = obj_feats.shape[0]

    clip2d = clip_feat.reshape(1, D_clip).astype(cdt)
    obj2d = obj_feats.astype(cdt)

    vmem = pl.BlockSpec(memory_space=pltpu.MemorySpace.VMEM)

    # Phase 1: clip GEMV + row bias, computed exactly once per forward.
    out_clip, row_bias = pl.pallas_call(
        easg_clip_kernel,
        out_shape=(
            jax.ShapeDtypeStruct((1, slab_w), jnp.float32),
            jax.ShapeDtypeStruct((1, slab_w), jnp.float32),
        ),
        in_specs=[vmem] * 5,
        out_specs=(vmem, vmem),
        cost_estimate=pl.CostEstimate(
            flops=2 * D_clip * slab_w,
            transcendentals=0,
            bytes_accessed=(D_clip * elt + D_clip * slab_w * elt
                            + 3 * slab_w * 4 + 2 * slab_w * 4),
        ),
    )(clip2d, prep["wc"], prep["bc"], prep["bo"], prep["rel_mask"])

    # Phase 2: streamed row grid.  Weight slab + row bias are VMEM-resident
    # (constant index_map); obj rows / output tiles are pipelined.
    TM = _choose_row_tile(N, D_obj, slab_w, act_bytes=elt)
    grid = (pl.cdiv(N, TM),)
    flops = 2 * N * D_obj * slab_w
    bytes_accessed = (N * D_obj * elt + D_obj * slab_w * elt
                      + slab_w * 4 + N * slab_w * 4)

    out_obj = pl.pallas_call(
        easg_rows_kernel,
        out_shape=jax.ShapeDtypeStruct((N, slab_w), jnp.float32),
        grid=grid,
        in_specs=[
            pl.BlockSpec((TM, D_obj), lambda i: (i, 0)),      # streamed rows
            pl.BlockSpec((D_obj, slab_w), lambda i: (0, 0)),  # resident weights
            pl.BlockSpec((1, slab_w), lambda i: (0, 0)),      # resident bias
        ],
        out_specs=pl.BlockSpec((TM, slab_w), lambda i: (i, 0)),
        compiler_params=pltpu.CompilerParams(
            dimension_semantics=("parallel",),
            vmem_limit_bytes=48 * 1024 * 1024,
        ),
        cost_estimate=pl.CostEstimate(flops=flops, transcendentals=0,
                                      bytes_accessed=bytes_accessed),
    )(obj2d, prep["wo"], row_bias)

    out_verb = out_clip[0, :n_verbs]
    out_objs = out_obj[:, :n_objs]
    out_rels = out_obj[:, rel_off:rel_off + n_rels]
    return out_verb, out_objs, out_rels


# ---------------------------------------------------------------------------
# Synthetic init matching torch.nn.Linear parameter shapes
# ---------------------------------------------------------------------------
def init_params(key, n_verbs, n_objs, n_rels, dim_clip_feat, dim_obj_feat):
    ks = jax.random.split(key, 6)

    def lin(kw, kb, out_dim, in_dim):
        bound = 1.0 / jnp.sqrt(in_dim)
        W = jax.random.uniform(kw, (out_dim, in_dim), jnp.float32, -bound, bound)
        b = jax.random.uniform(kb, (out_dim,), jnp.float32, -bound, bound)
        return W, b

    Wv, bv = lin(ks[0], ks[1], n_verbs, dim_clip_feat)
    Wo, bo = lin(ks[2], ks[3], n_objs, dim_obj_feat)
    Wr, br = lin(ks[4], ks[5], n_rels, dim_clip_feat + dim_obj_feat)
    return dict(Wv=Wv, bv=bv, Wo=Wo, bo=bo, Wr=Wr, br=br)


if __name__ == "__main__":
    # Small shapes consistent with the module's forward.
    dim_clip_feat = 256
    dim_obj_feat = 128
    n_verbs, n_objs, n_rels = 16, 24, 20
    n_obj_instances = 8

    key = jax.random.PRNGKey(0)
    k_clip, k_obj, k_params = jax.random.split(key, 3)

    clip_feat = jax.random.normal(k_clip, (dim_clip_feat,), jnp.float32)
    obj_feats = jax.random.normal(k_obj, (n_obj_instances, dim_obj_feat),
                                  jnp.float32)
    params = init_params(k_params, n_verbs, n_objs, n_rels,
                         dim_clip_feat, dim_obj_feat)

    # One-time weight preparation (hoisted out of the forward path).
    prep = prepare_params(params, dim_clip_feat, dim_obj_feat)
    jax.block_until_ready(prep)

    out_verb, out_objs, out_rels = easg_forward(clip_feat, obj_feats, prep)
    jax.block_until_ready((out_verb, out_objs, out_rels))

    # Reference check against plain f32 JAX (same semantics as the PyTorch
    # module).  Tolerances account for bf16 weights/activations (f32 accum).
    ref_verb = clip_feat @ params["Wv"].T + params["bv"]
    ref_objs = obj_feats @ params["Wo"].T + params["bo"]
    clip_exp = jnp.broadcast_to(clip_feat, (n_obj_instances, dim_clip_feat))
    ref_rels = jnp.concatenate([clip_exp, obj_feats], axis=1) @ params["Wr"].T \
               + params["br"]
    assert jnp.allclose(out_verb, ref_verb, atol=2e-2, rtol=2e-2)
    assert jnp.allclose(out_objs, ref_objs, atol=2e-2, rtol=2e-2)
    assert jnp.allclose(out_rels, ref_rels, atol=2e-2, rtol=2e-2)

    print("KERNEL_OK")
</pallas_src>

<mosaic_0001>
module attributes {stable_mosaic.version = 11 : i64} {
  func.func @easg_clip_kernel(%arg0: memref<1x256xbf16, #tpu.memory_space<vmem>>, %arg1: memref<256x128xbf16, #tpu.memory_space<vmem>>, %arg2: memref<1x128xf32, #tpu.memory_space<vmem>>, %arg3: memref<1x128xf32, #tpu.memory_space<vmem>>, %arg4: memref<1x128xf32, #tpu.memory_space<vmem>>, %arg5: memref<1x128xf32, #tpu.memory_space<vmem>>, %arg6: memref<1x128xf32, #tpu.memory_space<vmem>>) attributes {dimension_semantics = [], scalar_prefetch = 0 : i64, scratch_operands = 0 : i64, tpu.core_type = #tpu.core_type<tc>} {
    %c0 = arith.constant 0 : index
    %c0_0 = arith.constant 0 : index
    %0 = vector.load %arg0[%c0, %c0_0] : memref<1x256xbf16, #tpu.memory_space<vmem>>, vector<1x256xbf16>
    %c0_1 = arith.constant 0 : index
    %c0_2 = arith.constant 0 : index
    %1 = vector.load %arg1[%c0_1, %c0_2] : memref<256x128xbf16, #tpu.memory_space<vmem>>, vector<256x128xbf16>
    %cst = arith.constant dense<0.000000e+00> : vector<1x128xf32>
    %2 = tpu.matmul %0, %1, %cst {dimension_numbers = #tpu.dot_dimension_numbers<[1], [0], [0], [1], [0, 0, 1, 1], [], []>} : vector<1x256xbf16>, vector<256x128xbf16>, vector<1x128xf32> -> vector<1x128xf32>
    %c0_3 = arith.constant 0 : index
    %c0_4 = arith.constant 0 : index
    %3 = vector.load %arg2[%c0_3, %c0_4] : memref<1x128xf32, #tpu.memory_space<vmem>>, vector<1x128xf32>
    %4 = arith.addf %2, %3 : vector<1x128xf32>
    %c0_5 = arith.constant 0 : index
    %c0_6 = arith.constant 0 : index
    %5 = vector.load %arg5[%c0_5, %c0_6] : memref<1x128xf32, #tpu.memory_space<vmem>>, vector<1x128xf32>
    tpu.vector_store %arg5[%c0_5, %c0_6], %4 {strides = array<i32>} : memref<1x128xf32, #tpu.memory_space<vmem>>, vector<1x128xf32>,
    %c0_7 = arith.constant 0 : index
    %c0_8 = arith.constant 0 : index
    %6 = vector.load %arg3[%c0_7, %c0_8] : memref<1x128xf32, #tpu.memory_space<vmem>>, vector<1x128xf32>
    %c0_9 = arith.constant 0 : index
    %c0_10 = arith.constant 0 : index
    %7 = vector.load %arg4[%c0_9, %c0_10] : memref<1x128xf32, #tpu.memory_space<vmem>>, vector<1x128xf32>
    %8 = arith.mulf %7, %4 : vector<1x128xf32>
    %9 = arith.addf %6, %8 : vector<1x128xf32>
    %c0_11 = arith.constant 0 : index
    %c0_12 = arith.constant 0 : index
    %10 = vector.load %arg6[%c0_11, %c0_12] : memref<1x128xf32, #tpu.memory_space<vmem>>, vector<1x128xf32>
    tpu.vector_store %arg6[%c0_11, %c0_12], %9 {strides = array<i32>} : memref<1x128xf32, #tpu.memory_space<vmem>>, vector<1x128xf32>,
    return
  }
}

</mosaic_0001>

<bundles_post_ra>
// kernel: tpu_custom_call.1
= control target key start
LH: loop header
LB: loop body
LE: loop exit
PB: predicated region body
PF: predicated region fallthrough
CT: control target
= control target key end

     0   :  { %12 = vsyncpa [#allocation3], 0  ;;  %s546_s0 = inlined_call_operand.hbm [shape: bf16[1,256], index: 0, kind: input, shape index: {}]   ;;  %s547_s1 = inlined_call_operand.hbm [shape: bf16[256,128], index: 1, kind: input, shape index: {}]   ;;  %s548_s2 = inlined_call_operand.vmem [shape: f32[1,128], index: 2, kind: input, shape index: {}]   ;;  %s549_s3 = inlined_call_operand.vmem [shape: f32[1,128], index: 3, kind: input, shape index: {}]   ;;  %s550_s4 = inlined_call_operand.vmem [shape: f32[1,128], index: 4, kind: input, shape index: {}]   ;;  %s551_s5 = inlined_call_operand.hbm [shape: f32[1,128], index: 5, kind: output, shape index: {0}]   ;;  %s552_s6 = inlined_call_operand.hbm [shape: f32[1,128], index: 6, kind: output, shape index: {1}]  }
   0x1   :  { %13 = vsyncpa [#allocation6], 0 }
   0x2   :  { %14 = vsyncpa [#allocation4], 0 }
   0x3   :  { %15 = vsyncpa [#allocation9], 0  ;;  %s440_s21 = smov [#allocation2]   ;;  %s441_s23 = smov [#allocation5]  }
   0x4   :  { %s22_s22 = sshll.u32 %s440_s21, 4  ;;  %s31_s24 = sshll.u32 %s441_s23, 4  ;;  %s23_s22 = int_to_ptr.vmem [resolvable:$true] %s22_s22  ;;  %s482_s24 = int_to_ptr.vmem [resolvable:$true] %s31_s24 }
   0x5   :  { %s344_s27 = scalar_lea.hbm %s546_s0, 32 }
   0x6   :  { %p345_p0 = scmp.ne.s32.totalorder %s546_s0, %s344_s27  ;;  %p348_p1 = scmp.lt.u32.totalorder %s344_s27, %s546_s0 }
   0x8   :  { %p350_p2 = pnand %p348_p1, %p345_p0 }
   0xa   :  { %353 = shalt.err (!%p350_p2)
}
   0xb   :  { %s354_s8 = scalar_lea.vmem %s23_s22, 32  ;;  %p359_p4 = scmp.lt.s32.totalorder %s23_s22, %s23_s22 }
   0xc   :  { %p355_p3 = scmp.ne.s32.totalorder %s23_s22, %s354_s8  ;;  %p360_p5 = scmp.lt.s32.totalorder %s354_s8, %s354_s8 }
   0xe   :  { %p361_p6 = por %p360_p5, %p359_p4 }
  0x10   :  { %p362_p7 = pnand %p361_p6, %p355_p3 }
  0x12   :  { %365 = shalt.err (!%p362_p7)
}
  0x13   :  { %25 = dma.hbm_to_vmem [thread:$0]  %s546_s0, 32, %s23_s22, [#allocation3]  }
  0x14   :  { %s366_s13 = scalar_lea.hbm %s547_s1, 2048 }
  0x15   :  { %p367_p8 = scmp.ne.s32.totalorder %s547_s1, %s366_s13  ;;  %p370_p9 = scmp.lt.u32.totalorder %s366_s13, %s547_s1 }
  0x17   :  { %p372_p10 = pnand %p370_p9, %p367_p8 }
  0x19   :  { %375 = shalt.err (!%p372_p10)
}
  0x1a   :  { %s376_s18 = scalar_lea.vmem %s482_s24, 2048  ;;  %p381_p12 = scmp.lt.s32.totalorder %s482_s24, %s482_s24 }
  0x1b   :  { %p377_p11 = scmp.ne.s32.totalorder %s482_s24, %s376_s18  ;;  %p382_p13 = scmp.lt.s32.totalorder %s376_s18, %s376_s18 }
  0x1d   :  { %p383_p0 = por %p382_p13, %p381_p12 }
  0x1f   :  { %p384_p1 = pnand %p383_p0, %p377_p11 }
  0x21   :  { %387 = shalt.err (!%p384_p1)
}
  0x22   :  { %s442_s0 = smov 64   ;;  %s443_s19 = smov 4  }
  0x23   :  { %37 = dma.hbm_to_vmem [thread:$0]  %s547_s1, 2048, %s482_s24, [#allocation6], %s442_s0, %s442_s0, %s443_s19  }
  0x24   :  { %432 = dma.done.wait [#allocation3], 32  }
  0x25   :  { %433 = vsyncadd [#allocation3], 4294967264 }
  0x26   :  { %434 = dma.done.wait [#allocation6], 2048  }
  0x27   :  { %435 = vsyncadd [#allocation6], 4294965248  ;;  %v328_v0 = vld [vmem:[#allocation5 + $0x40] sm:$0xff]   ;;  %v330_v2 = vld [vmem:[#allocation5 + $0x48] sm:$0xff]   ;;  %v444_v6 = vmov 1966171168   ;;  %v97_v8 = vlaneseq }
  0x28   :  { %v329_v1 = vld [vmem:[#allocation5] sm:$0xff]   ;;  %299 = vmatprep.subr.bf16.mxu0 %v328_v0  ;;  %v331_v3 = vld [vmem:[#allocation5 + $0x8] sm:$0xff]   ;;  %v332_v4 = vld [vmem:[#allocation5 + $0x50] sm:$0xff]   ;;  %v95_v7 = vunpack.c.l.s4 %v444_v6  ;;  %s445_s23 = smov [#allocation7]   ;;  %s446_s29 = smov [#allocation8]  }
  0x29   :  { %300 = vmatpush3.bf16.msra.mxu0 %v329_v1  ;;  %v333_v5 = vld [vmem:[#allocation5 + $0x10] sm:$0xff]   ;;  %v334_v9 = vld [vmem:[#allocation5 + $0x58] sm:$0xff]   ;;  %v98_v12 = vshrl.u32 %v97_v8, 7  ;;  %v336_v13 = vld [vmem:[#allocation5 + $0x60] sm:$0xff]   ;;  %s258_s24 = sshll.u32 %s445_s23, 4  ;;  %s268_s30 = sshll.u32 %s446_s29, 4  ;;  %s259_s24 = int_to_ptr.vmem [resolvable:$true] %s258_s24  ;;  %s269_s30 = int_to_ptr.vmem [resolvable:$true] %s268_s30 }
  0x2a   :  { %301 = vmatprep.subr.bf16.mxu0 %v330_v2  ;;  %v335_v10 = vld [vmem:[#allocation5 + $0x18] sm:$0xff]   ;;  %v96_v11 = vunpack.c.0.s8 %v95_v7  ;;  %v337_v14 = vld [vmem:[#allocation5 + $0x20] sm:$0xff]   ;;  %v338_v16 = vld [vmem:[#allocation5 + $0x68] sm:$0xff]   ;;  %s392_s7 = scalar_lea.vmem %s259_s24, 32  ;;  %p393_p3 = scmp.lt.s32.totalorder %s259_s24, %s259_s24 }
  0x2b   :  { %v282_v17 = vld.sshfl [vmem:[#allocation2] sm:$0x11 pattern:$0x75316420]  ;;  %v339_v19 = vld [vmem:[#allocation5 + $0x28] sm:$0xff]   ;;  %v340_v21 = vld [vmem:[#allocation5 + $0x70] sm:$0xff]  }
  0x2c   :  { %v99_v15 = vsub.s32 %v96_v11, %v98_v12  ;;  %v93_v18 = vcombine.high %v282_v17, %v282_v17  ;;  %v341_v22 = vld [vmem:[#allocation5 + $0x30] sm:$0xff]   ;;  %v342_v23 = vld [vmem:[#allocation5 + $0x78] sm:$0xff]  }
  0x2d   :  { %302 = vmatpush3.bf16.msra.mxu0 %v331_v3  ;;  %v343_v24 = vld [vmem:[#allocation5 + $0x38] sm:$0xff]  }
  0x2e   :  { %303 = vmatprep.subr.bf16.mxu0 %v332_v4  ;;  %v107_v20 = vrot.slane %v93_v18, %v99_v15  ;;  %v100_v25 = vrot.slane %v282_v17, %v99_v15  ;;  %v84_v27 = vld [vmem:[%s548_s2] sm:$0x1]  ;;  %s388_s2 = scalar_lea.vmem %s259_s24, 16 }
  0x2f   :  { %v248_v31 = vld [vmem:[%s550_s4] sm:$0x1]  ;;  %p389_p2 = scmp.ne.s32.totalorder %s259_s24, %s388_s2  ;;  %p394_p4 = scmp.lt.s32.totalorder %s392_s7, %s388_s2 }
  0x30   :  { %238 = vmatprep.mubr.bf16.mxu0 %v107_v20  ;;  %v247_v34 = vld [vmem:[%s549_s3] sm:$0x1] }
  0x31   :  { %304 = vmatpush3.bf16.msra.mxu0 %v333_v5  ;;  %p395_p5 = por %p394_p4, %p393_p3 }
  0x32   :  { %305 = vmatprep.subr.bf16.mxu0 %v334_v9 }
  0x33   :  { %p396_p6 = pnand %p395_p5, %p389_p2 }
  0x35   :  { %306 = vmatpush3.bf16.msra.mxu0 %v335_v10 }
  0x36   :  { %307 = vmatprep.subr.bf16.mxu0 %v336_v13 }
  0x39   :  { %308 = vmatpush3.bf16.msra.mxu0 %v337_v14 }
  0x3a   :  { %309 = vmatprep.subr.bf16.mxu0 %v338_v16 }
  0x3d   :  { %310 = vmatpush3.bf16.msra.mxu0 %v339_v19 }
  0x3e   :  { %311 = vmatprep.subr.bf16.mxu0 %v340_v21 }
  0x41   :  { %312 = vmatpush3.bf16.msra.mxu0 %v341_v22 }
  0x42   :  { %313 = vmatprep.subr.bf16.mxu0 %v342_v23 }
  0x45   :  { %314 = vmatpush3.bf16.msra.mxu0 %v343_v24 }
  0x48   :  { %239 = vmatmul.mubr.bf16.vlgmr.msra.gmra.mrb[0].mxu0 %v100_v25 }
 0x11b   :  { %v315_v26 = vpop.f32.mrb[0].mxu0 }
 0x11c   :  { %v316_v28 = vpop.f32.mrb[1].mxu0 }
 0x11d   :  { %v317_v29 = vadd.f32 %v316_v28, %v315_v26  ;;  %v318_v30 = vpop.f32.mrb[2].mxu0 }
 0x11e   :  { %v319_v32 = vpop.f32.mrb[3].mxu0 }
 0x11f   :  { %v241_v33 = vadd.f32 %v317_v29, %v84_v27 }
 0x121   :  { %v249_v35 = vmul.f32 %v248_v31, %v241_v33  ;;  %246 = vst [vmem:[#allocation7] sm:$0x1] %v241_v33 }
 0x122   :  { %399 = shalt.err (!%p396_p6)
}
 0x123   :  { %s400_s9 = scalar_lea.hbm %s551_s5, 16 }
 0x124   :  { %p401_p7 = scmp.ne.s32.totalorder %s551_s5, %s400_s9  ;;  %p404_p8 = scmp.lt.u32.totalorder %s400_s9, %s551_s5 }
 0x126   :  { %p406_p9 = pnand %p404_p8, %p401_p7 }
 0x128   :  { %409 = shalt.err (!%p406_p9)
}
 0x129   :  { %261 = dma.vmem_to_hbm [thread:$0]  %s259_s24, 16, %s551_s5, [#allocation4]   ;;  %v250_v36 = vadd.f32 %v249_v35, %v247_v34 }
 0x12a   :  { %s410_s15 = scalar_lea.vmem %s269_s30, 16  ;;  %s414_s16 = scalar_lea.vmem %s269_s30, 32 }
 0x12b   :  { %251 = vst [vmem:[#allocation8] sm:$0x1] %v250_v36  ;;  %p411_p10 = scmp.ne.s32.totalorder %s269_s30, %s410_s15  ;;  %p415_p11 = scmp.lt.s32.totalorder %s269_s30, %s269_s30 }
 0x12c   :  { %p416_p12 = scmp.lt.s32.totalorder %s414_s16, %s410_s15 }
 0x12e   :  { %p417_p13 = por %p416_p12, %p415_p11 }
 0x130   :  { %p418_p0 = pnand %p417_p13, %p411_p10 }
 0x132   :  { %421 = shalt.err (!%p418_p0)
}
 0x133   :  { %s422_s0 = scalar_lea.hbm %s552_s6, 16 }
 0x134   :  { %p423_p1 = scmp.ne.s32.totalorder %s552_s6, %s422_s0  ;;  %p426_p2 = scmp.lt.u32.totalorder %s422_s0, %s552_s6 }
 0x136   :  { %p428_p3 = pnand %p426_p2, %p423_p1 }
 0x138   :  { %431 = shalt.err (!%p428_p3)
}
 0x139   :  { %271 = dma.vmem_to_hbm [thread:$0]  %s269_s30, 16, %s552_s6, [#allocation9]  }
 0x13a   :  { %436 = dma.done.wait [#allocation4], 16  }
 0x13b   :  { %437 = vsyncadd [#allocation4], 4294967280 }
 0x13c   :  { %438 = dma.done.wait [#allocation9], 16  }
 0x13d   :  { %439 = vsyncadd [#allocation9], 4294967280 }
 0x13e   :  { %278 = vsyncpa [#allocation3], 1 }
 0x13f   :  { %279 = vsyncpa [#allocation6], 1 }
 0x140   :  { %280 = vsyncpa [#allocation4], 1 }
 0x141   :  { %281 = vsyncpa [#allocation9], 1 }

</bundles_post_ra>
